<compile_context>
chip_gen: v7x
topology: tpu7x:2x2x1
jax: 0.10.0
libtpu: 0.0.40
codegen_flags: <defaults>
</compile_context>

<pallas_src>
import functools
import math

import jax
import jax.numpy as jnp
from jax.experimental import pallas as pl
from jax.experimental.pallas import tpu as pltpu

_SECONDS_FEAT = 7                 # trip[..., 7] = 'seconds' -> rewritten to minute-of-day
_VMEM_BUDGET_BYTES = 12 << 20     # working-set target (fits v5e's 16 MiB scoped default)


# ---------------------------------------------------------------------------
# Positional encoding (canonical START/libcity sinusoidal PE). Host-side precompute.
# ---------------------------------------------------------------------------
def sinusoidal_positional_encoding(max_len, d_model, dtype=jnp.float32):
    position = jnp.arange(max_len, dtype=jnp.float32)[:, None]
    div_term = jnp.exp(jnp.arange(0, d_model, 2, dtype=jnp.float32)
                       * (-math.log(10000.0) / d_model))
    pe = jnp.zeros((max_len, d_model), dtype=jnp.float32)
    pe = pe.at[:, 0::2].set(jnp.sin(position * div_term))
    pe = pe.at[:, 1::2].set(jnp.cos(position * div_term)[:, : d_model // 2])
    return pe.astype(dtype)


# ---------------------------------------------------------------------------
# Fused Pallas kernel
# ---------------------------------------------------------------------------
def _pro_embedding_kernel(trip_ref, pe_ref, *rest, feats, lookup_mode):
    """One fused pass: per-feature lookups + token embedding + PE, accumulated in f32.

    trip_ref : (1, tile_l, F)        streamed raw trip features for this (batch, seq) tile
    pe_ref   : (L_pad, D) float32    FULL positional encoding, VMEM-resident (constant
                                     index_map -> fetched once, never re-DMAed per step)
    rest     : (*table_refs, o_ref)  VMEM-resident embedding tables + output tile
    """
    table_refs = rest[:-1]
    o_ref = rest[-1]
    tile_l = trip_ref.shape[1]
    d_model = pe_ref.shape[1]

    tr = trip_ref[0]                                          # (tile_l, F)

    # Positional-encoding rows for this seq tile, sliced from the resident copy.
    if pe_ref.shape[0] == tile_l:
        acc = pe_ref[...].astype(jnp.float32)
    else:
        start = pl.multiple_of(pl.program_id(1) * tile_l, tile_l)
        acc = pe_ref[pl.ds(start, tile_l), :].astype(jnp.float32)

    for f, tbl_ref in zip(feats, table_refs):
        col = tr[:, f].astype(jnp.float32)                    # (tile_l,)
        if f == _SECONDS_FEAT:
            # trip[:, :, 7] = round(trip[:, :, 7] / 60) % 1440  (seconds -> minute-of-day)
            col = jnp.round(col / 60.0)
            col = col - jnp.floor(col / 1440.0) * 1440.0
            col = jnp.where(col >= 1440.0, col - 1440.0, col)  # guard fp edges of the
            col = jnp.where(col < 0.0, col + 1440.0, col)      # floor-mod formulation
        idx = col.astype(jnp.int32)                            # (tile_l,)
        tbl = tbl_ref[...]
        vocab = tbl.shape[0]

        if lookup_mode == "take":
            # Exact f32 row gather from the VMEM-resident table (no one-hot, no MXU).
            rows = jnp.take(tbl, idx, axis=0, mode="clip")
        elif lookup_mode == "take_along":
            idx2d = jnp.broadcast_to(jnp.clip(idx, 0, vocab - 1)[:, None],
                                     (tile_l, d_model))
            rows = jnp.take_along_axis(tbl, idx2d, axis=0)
        else:  # "onehot": single-pass bf16 one-hot @ table on the MXU (fallback path)
            onehot = (idx[:, None] == jax.lax.broadcasted_iota(
                jnp.int32, (tile_l, vocab), 1)).astype(jnp.bfloat16)
            rows = jnp.dot(onehot, tbl.astype(jnp.bfloat16),
                           preferred_element_type=jnp.float32)

        acc = acc + rows.astype(jnp.float32)

    # o_ref is (1, tile_l, D) or the lane-dense view (1, tile_l // r, r * D).
    o_ref[...] = acc.reshape(o_ref.shape).astype(o_ref.dtype)


# ---------------------------------------------------------------------------
# VMEM accounting & tile selection
# ---------------------------------------------------------------------------
def _round_up(n, m):
    return ((n + m - 1) // m) * m


def _resident_vmem_bytes(d_model, tables, pe_rows):
    """Tables + PE are resident via constant index_maps; the pipeline still allocates
    2 buffers each (TODO(synk): pipeline_mode=pl.Buffered(1) would halve this)."""
    lane_d = _round_up(d_model, 128)
    total = 2 * _round_up(pe_rows, 8) * lane_d * 4
    for t in tables:
        total += 2 * _round_up(t.shape[0], 8) * lane_d * 4
    return total


def _per_row_vmem_bytes(d_model, fea_dim, tables, out_itemsize):
    """VMEM bytes per seq row: streamed blocks (double-buffered, lane padding included)
    plus the in-kernel working set (conservatively includes the fallback one-hot)."""
    lane_f = _round_up(fea_dim, 128)
    lane_d = _round_up(d_model, 128)
    max_vocab = max((t.shape[0] for t in tables), default=1)
    per_row = 2 * lane_f * 4                    # trip tile, double-buffered
    per_row += 2 * lane_d * out_itemsize        # output tile, double-buffered
    per_row += 4 * lane_d * 4                   # f32 accumulator + lookup temps
    per_row += _round_up(max_vocab, 128) * 2    # bf16 one-hot (fallback worst case)
    return per_row


def _pick_tile_l(batch, seq_len, d_model, fea_dim, tables, out_itemsize,
                 budget_bytes=_VMEM_BUDGET_BYTES):
    """Largest seq tile (multiple of 8 sublanes, <= 1024 rows) whose working set fits
    the budget; big tiles amortize the ~0.35us per-grid-step overhead."""
    if seq_len <= 8:
        return seq_len
    resident = _resident_vmem_bytes(d_model, tables, _round_up(seq_len, 8))
    per_row = _per_row_vmem_bytes(d_model, fea_dim, tables, out_itemsize)
    avail = max(budget_bytes - resident, 64 * 1024)
    tile = max(8, min(1024, _round_up(seq_len, 8), (avail // per_row) // 8 * 8))
    # v7x shards "parallel" grid axes over 2 TensorCores: keep >= 2 grid steps.
    if batch * pl.cdiv(seq_len, tile) < 2:
        tile = max(8, _round_up(pl.cdiv(seq_len, 2), 8))
    return tile


# ---------------------------------------------------------------------------
# pallas_call wrapper
# ---------------------------------------------------------------------------
def _pro_embedding_pallas(trip, pe_pad, tables, *, feats, out_dtype, tile_l,
                          lookup_mode, lane_dense_r):
    B, L, F = trip.shape
    L_pad, D = pe_pad.shape
    num_tiles = pl.cdiv(L, tile_l)
    r = lane_dense_r

    in_specs = [
        # Streamed (batch, seq) tile of raw trip features.
        pl.BlockSpec((1, tile_l, F), lambda b, j: (b, j, 0)),
        # Whole positional encoding, VMEM-resident across the grid (no per-step re-DMA).
        pl.BlockSpec((L_pad, D), lambda b, j: (0, 0)),
    ] + [
        # Small embedding tables, VMEM-resident across the grid.
        # TODO(synk): for very large token vocabularies switch to a scalar-prefetch
        # DMA gather instead of whole-table residency.
        pl.BlockSpec(t.shape, lambda b, j: (0, 0))
        for t in tables
    ]

    if r > 1:
        # Lane-dense output view: (B, L, D) -> (B, L // r, r * D) with r * D == 128
        # (identical contiguous HBM layout), so every store is a full-lane vst.
        out_shape = jax.ShapeDtypeStruct((B, L // r, r * D), out_dtype)
        out_specs = pl.BlockSpec((1, tile_l // r, r * D), lambda b, j: (b, j, 0))
    else:
        out_shape = jax.ShapeDtypeStruct((B, L, D), out_dtype)
        out_specs = pl.BlockSpec((1, tile_l, D), lambda b, j: (b, j, 0))

    out_itemsize = jax.dtypes.canonicalize_dtype(out_dtype).itemsize
    est = (_resident_vmem_bytes(D, tables, L_pad)
           + tile_l * _per_row_vmem_bytes(D, F, tables, out_itemsize))
    vmem_limit = int(min(max(int(est * 1.5), 16 << 20), 48 << 20))

    kernel = functools.partial(_pro_embedding_kernel, feats=tuple(feats),
                               lookup_mode=lookup_mode)

    out = pl.pallas_call(
        kernel,
        out_shape=out_shape,
        grid=(B, num_tiles),
        in_specs=in_specs,
        out_specs=out_specs,
        compiler_params=pltpu.CompilerParams(
            dimension_semantics=("parallel", "parallel"),
            vmem_limit_bytes=vmem_limit,
        ),
    )(trip, pe_pad, *tables)

    if r > 1:
        out = out.reshape(B, L, D)    # contiguous metadata reshape only
    return out


# ---------------------------------------------------------------------------
# AOT config probe: pick the fastest lookup/store scheme that lowers on this jax/libtpu.
# ---------------------------------------------------------------------------
_CONFIG_CACHE = {}


def _select_config(trip_dtype, B, L, F, D, tables, feats, out_dtype, tile_l, r_dense):
    out_name = jax.dtypes.canonicalize_dtype(out_dtype).name
    key = (str(trip_dtype), B, L, F, D, tuple(t.shape for t in tables),
           tuple(feats), out_name, tile_l, r_dense)
    if key in _CONFIG_CACHE:
        return _CONFIG_CACHE[key]

    L_pad = pl.cdiv(L, tile_l) * tile_l
    trip_s = jax.ShapeDtypeStruct((B, L, F), trip_dtype)
    pe_s = jax.ShapeDtypeStruct((L_pad, D), jnp.float32)
    tab_s = [jax.ShapeDtypeStruct(t.shape, t.dtype) for t in tables]

    dense_opts = (True, False) if r_dense > 1 else (False,)
    candidates = [(m, d) for m in ("take", "take_along", "onehot") for d in dense_opts]
    chosen = candidates[-1]
    for mode, dense in candidates:
        fn = functools.partial(
            _pro_embedding_pallas, feats=tuple(feats), out_dtype=out_dtype,
            tile_l=tile_l, lookup_mode=mode, lane_dense_r=r_dense if dense else 1)
        try:
            jax.jit(fn).lower(trip_s, pe_s, tab_s).compile()
            chosen = (mode, dense)
            break
        except Exception:
            continue
    _CONFIG_CACHE[key] = chosen
    return chosen


# ---------------------------------------------------------------------------
# Module-level forward (parameter handling = cheap glue; all heavy work is in-kernel)
# ---------------------------------------------------------------------------
def pro_embedding_forward(trip, module, pretrain=False, out_dtype=None):
    B, L, F = trip.shape
    D = module.d_model
    out_dtype = trip.dtype if out_dtype is None else out_dtype
    assert L <= module.pe.shape[0], "sequence longer than PositionalEncoding max_len=512"

    feats = list(module.dis_feats)
    tables = list(module.dis_embeds)
    if module.num_tokens and module.token_embedding is not None:
        feats.append(module.token_feat if pretrain else module.road_feat)
        tables.append(module.token_embedding)
        # TODO(synk): GAT encoder (graph scatter-add neighborhood aggregation) is not
        # ported; construct the module with add_gat=False.

    if not tables:
        module.last_lookup_mode = None
        return jnp.broadcast_to(module.pe[:L][None], (B, L, D)).astype(out_dtype)

    out_itemsize = jax.dtypes.canonicalize_dtype(out_dtype).itemsize
    tile_l = _pick_tile_l(B, L, D, F, tables, out_itemsize)
    num_tiles = pl.cdiv(L, tile_l)

    # Lane-dense output only when d_model < 128 divides 128 and the shapes line up.
    r = 128 // D if (D < 128 and 128 % D == 0) else 1
    can_dense = (r > 1 and L % r == 0 and tile_l % r == 0
                 and ((tile_l // r) % 8 == 0 or (num_tiles == 1 and tile_l == L)))
    r_dense = r if can_dense else 1

    L_pad = num_tiles * tile_l
    pe_l = module.pe[:L].astype(jnp.float32)
    pe_pad = pe_l if L_pad == L else jnp.zeros((L_pad, D), jnp.float32).at[:L].set(pe_l)

    mode, dense = _select_config(trip.dtype, B, L, F, D, tables, feats, out_dtype,
                                 tile_l, r_dense)
    module.last_lookup_mode = mode

    out = _pro_embedding_pallas(
        trip, pe_pad, tables, feats=feats, out_dtype=out_dtype, tile_l=tile_l,
        lookup_mode=mode, lane_dense_r=r_dense if dense else 1)
    # TODO(synk): nn.Dropout (training-mode RNG) is not fused; construct with dropout=None.
    return out


class ProEmbedding:
    """JAX/Pallas equivalent of the PyTorch ProEmbedding (dropout=None, add_gat=False)."""

    def __init__(self, d_model, num_embeds, dis_feats, road_feat, num_tokens=None,
                 token_feat=None, dropout=None, add_gat=False, gat_num_features=None,
                 gat_num_heads=None, gat_dropout=None, *, key):
        if add_gat:
            raise NotImplementedError("TODO(synk): GAT encoder not ported to Pallas.")
        if dropout:
            raise NotImplementedError("TODO(synk): dropout not fused; use dropout=None.")
        assert len(dis_feats) == len(num_embeds)
        self.d_model = d_model
        self.dis_feats = list(dis_feats)
        self.road_feat = road_feat
        self.num_tokens = num_tokens
        self.token_feat = token_feat
        self.last_lookup_mode = None

        keys = jax.random.split(key, len(num_embeds) + 1)
        scale = 1.0 / math.sqrt(d_model)
        self.dis_embeds = [scale * jax.random.normal(k, (n, d_model), dtype=jnp.float32)
                           for k, n in zip(keys[:-1], num_embeds)]
        self.token_embedding = None
        if num_tokens and token_feat is not None:
            self.token_embedding = scale * jax.random.normal(
                keys[-1], (num_tokens + 2, d_model), dtype=jnp.float32)
        self.pe = sinusoidal_positional_encoding(512, d_model)

    def __call__(self, trip, edge_index_input=None, edge_prob_input=None,
                 pretrain=False, out_dtype=None):
        return pro_embedding_forward(trip, self, pretrain=pretrain, out_dtype=out_dtype)


# ---------------------------------------------------------------------------
# Self-test
# ---------------------------------------------------------------------------
if __name__ == "__main__":
    key = jax.random.PRNGKey(0)
    k_trip, k_secs, k_params = jax.random.split(key, 3)

    B, L, F = 2, 8, 8            # (batch, max_len, fea_dim) per the module docstring
    d_model = 32
    dis_feats = [0, 5, 7]        # 'tod', 'weekday', preprocessed 'seconds' (minute-of-day)
    num_embeds = [24, 7, 1440]
    road_feat, token_feat, num_tokens = 1, 1, 50

    ks = jax.random.split(k_trip, 4)
    trip = jax.random.normal(ks[0], (B, L, F), dtype=jnp.float32)
    trip = trip.at[:, :, 0].set(jax.random.randint(ks[1], (B, L), 0, 24).astype(jnp.float32))
    trip = trip.at[:, :, 5].set(jax.random.randint(ks[2], (B, L), 0, 7).astype(jnp.float32))
    trip = trip.at[:, :, 1].set(
        jax.random.randint(ks[3], (B, L), 0, num_tokens).astype(jnp.float32))
    trip = trip.at[:, :, 7].set(
        jax.random.uniform(k_secs, (B, L), minval=0.0, maxval=86400.0))

    module = ProEmbedding(
        d_model=d_model, num_embeds=num_embeds, dis_feats=dis_feats,
        road_feat=road_feat, num_tokens=num_tokens, token_feat=token_feat,
        dropout=None, add_gat=False, key=k_params)

    out = jax.block_until_ready(module(trip))

    # Pure-JAX reference of the PyTorch forward semantics (dropout=None, add_gat=False).
    sec = jnp.round(trip[:, :, 7] / 60.0) % 1440.0
    trip_ref = trip.at[:, :, 7].set(sec)
    ref = jnp.broadcast_to(module.pe[:L][None], (B, L, d_model)).astype(jnp.float32)
    for f, tbl in zip(dis_feats, module.dis_embeds):
        ref = ref + jnp.take(tbl, trip_ref[:, :, f].astype(jnp.int32), axis=0)
    ref = ref + jnp.take(module.token_embedding,
                         trip_ref[:, :, road_feat].astype(jnp.int32), axis=0)

    assert out.shape == (B, L, d_model) and out.dtype == trip.dtype
    # Gather paths are exact f32; the one-hot fallback truncates tables to bf16.
    tol = 1e-4 if module.last_lookup_mode in ("take", "take_along") else 2e-2
    max_err = float(jnp.max(jnp.abs(out.astype(jnp.float32) - ref)))
    assert max_err <= tol, f"max_err={max_err} (mode={module.last_lookup_mode})"

    print("KERNEL_OK")
</pallas_src>

<mosaic_0001>
module attributes {stable_mosaic.version = 11 : i64} {
  func.func @_pro_embedding_kernel(%arg0: i32, %arg1: i32, %arg2: memref<1x8x8xf32, #tpu.memory_space<vmem>>, %arg3: memref<8x32xf32, #tpu.memory_space<vmem>>, %arg4: memref<24x32xf32, #tpu.memory_space<vmem>>, %arg5: memref<7x32xf32, #tpu.memory_space<vmem>>, %arg6: memref<1440x32xf32, #tpu.memory_space<vmem>>, %arg7: memref<52x32xf32, #tpu.memory_space<vmem>>, %arg8: memref<1x8x32xf32, #tpu.memory_space<vmem>>) attributes {dimension_semantics = [#tpu.dimension_semantics<parallel>, #tpu.dimension_semantics<parallel>], iteration_bounds = array<i64: 2, 1>, scalar_prefetch = 0 : i64, scratch_operands = 0 : i64, tpu.core_type = #tpu.core_type<tc>, window_params = [{transform_indices = @transform_0, window_bounds = array<i64: 1, 8, 8>}, {pipeline_mode = #tpu.pipeline_mode<synchronous>, transform_indices = @transform_1, window_bounds = array<i64: 8, 32>}, {pipeline_mode = #tpu.pipeline_mode<synchronous>, transform_indices = @transform_2, window_bounds = array<i64: 24, 32>}, {pipeline_mode = #tpu.pipeline_mode<synchronous>, transform_indices = @transform_3, window_bounds = array<i64: 7, 32>}, {pipeline_mode = #tpu.pipeline_mode<synchronous>, transform_indices = @transform_4, window_bounds = array<i64: 1440, 32>}, {pipeline_mode = #tpu.pipeline_mode<synchronous>, transform_indices = @transform_5, window_bounds = array<i64: 52, 32>}, {transform_indices = @transform_6, window_bounds = array<i64: 1, 8, 32>}]} {
    %c0 = arith.constant 0 : index
    %c0_0 = arith.constant 0 : index
    %c0_1 = arith.constant 0 : index
    %0 = vector.load %arg2[%c0, %c0_0, %c0_1] : memref<1x8x8xf32, #tpu.memory_space<vmem>>, vector<1x8x8xf32>
    %1 = vector.shape_cast %0 : vector<1x8x8xf32> to vector<8x8xf32>
    %c0_2 = arith.constant 0 : index
    %c0_3 = arith.constant 0 : index
    %2 = vector.load %arg3[%c0_2, %c0_3] : memref<8x32xf32, #tpu.memory_space<vmem>>, vector<8x32xf32>
    %3 = vector.extract_strided_slice %1 {offsets = [0, 0], sizes = [8, 1], strides = [1, 1]} : vector<8x8xf32> to vector<8x1xf32>
    %4 = vector.shape_cast %3 : vector<8x1xf32> to vector<8xf32>
    %5 = arith.fptosi %4 : vector<8xf32> to vector<8xi32>
    %c0_4 = arith.constant 0 : index
    %c0_5 = arith.constant 0 : index
    %6 = vector.load %arg4[%c0_4, %c0_5] : memref<24x32xf32, #tpu.memory_space<vmem>>, vector<24x32xf32>
    %7 = vector.shape_cast %5 : vector<8xi32> to vector<8x1xi32>
    %8 = tpu.iota {dimensions = array<i32: 1>} : vector<8x24xi32>
    %9 = vector.broadcast %7 : vector<8x1xi32> to vector<8x24xi32>
    %10 = arith.cmpi eq, %9, %8 : vector<8x24xi32>
    %11 = arith.extui %10 : vector<8x24xi1> to vector<8x24xi32>
    %12 = arith.sitofp %11 : vector<8x24xi32> to vector<8x24xf32>
    %13 = arith.truncf %12 : vector<8x24xf32> to vector<8x24xbf16>
    %14 = arith.truncf %6 : vector<24x32xf32> to vector<24x32xbf16>
    %cst = arith.constant dense<0.000000e+00> : vector<8x32xf32>
    %15 = tpu.matmul %13, %14, %cst {dimension_numbers = #tpu.dot_dimension_numbers<[1], [0], [0], [1], [0, 0, 1, 1], [], []>} : vector<8x24xbf16>, vector<24x32xbf16>, vector<8x32xf32> -> vector<8x32xf32>
    %16 = arith.addf %2, %15 : vector<8x32xf32>
    %17 = vector.extract_strided_slice %1 {offsets = [0, 5], sizes = [8, 1], strides = [1, 1]} : vector<8x8xf32> to vector<8x1xf32>
    %18 = vector.shape_cast %17 : vector<8x1xf32> to vector<8xf32>
    %19 = arith.fptosi %18 : vector<8xf32> to vector<8xi32>
    %c0_6 = arith.constant 0 : index
    %c0_7 = arith.constant 0 : index
    %20 = vector.load %arg5[%c0_6, %c0_7] : memref<7x32xf32, #tpu.memory_space<vmem>>, vector<7x32xf32>
    %21 = vector.shape_cast %19 : vector<8xi32> to vector<8x1xi32>
    %22 = tpu.iota {dimensions = array<i32: 1>} : vector<8x7xi32>
    %23 = vector.broadcast %21 : vector<8x1xi32> to vector<8x7xi32>
    %24 = arith.cmpi eq, %23, %22 : vector<8x7xi32>
    %25 = arith.extui %24 : vector<8x7xi1> to vector<8x7xi32>
    %26 = arith.sitofp %25 : vector<8x7xi32> to vector<8x7xf32>
    %27 = arith.truncf %26 : vector<8x7xf32> to vector<8x7xbf16>
    %28 = arith.truncf %20 : vector<7x32xf32> to vector<7x32xbf16>
    %cst_8 = arith.constant dense<0.000000e+00> : vector<8x32xf32>
    %29 = tpu.matmul %27, %28, %cst_8 {dimension_numbers = #tpu.dot_dimension_numbers<[1], [0], [0], [1], [0, 0, 1, 1], [], []>} : vector<8x7xbf16>, vector<7x32xbf16>, vector<8x32xf32> -> vector<8x32xf32>
    %30 = arith.addf %16, %29 : vector<8x32xf32>
    %31 = vector.extract_strided_slice %1 {offsets = [0, 7], sizes = [8, 1], strides = [1, 1]} : vector<8x8xf32> to vector<8x1xf32>
    %32 = vector.shape_cast %31 : vector<8x1xf32> to vector<8xf32>
    %cst_9 = arith.constant 6.000000e+01 : f32
    %33 = vector.broadcast %cst_9 : f32 to vector<8xf32>
    %34 = arith.divf %32, %33 : vector<8xf32>
    %35 = math.roundeven %34 : vector<8xf32>
    %cst_10 = arith.constant 1.440000e+03 : f32
    %36 = vector.broadcast %cst_10 : f32 to vector<8xf32>
    %37 = arith.divf %35, %36 : vector<8xf32>
    %38 = math.floor %37 : vector<8xf32>
    %cst_11 = arith.constant 1.440000e+03 : f32
    %39 = vector.broadcast %cst_11 : f32 to vector<8xf32>
    %40 = arith.mulf %38, %39 : vector<8xf32>
    %41 = arith.subf %35, %40 : vector<8xf32>
    %cst_12 = arith.constant 1.440000e+03 : f32
    %42 = vector.broadcast %cst_12 : f32 to vector<8xf32>
    %43 = arith.cmpf oge, %41, %42 : vector<8xf32>
    %cst_13 = arith.constant 1.440000e+03 : f32
    %44 = vector.broadcast %cst_13 : f32 to vector<8xf32>
    %45 = arith.subf %41, %44 : vector<8xf32>
    %46 = arith.select %43, %45, %41 : vector<8xi1>, vector<8xf32>
    %cst_14 = arith.constant 0.000000e+00 : f32
    %47 = vector.broadcast %cst_14 : f32 to vector<8xf32>
    %48 = arith.cmpf olt, %46, %47 : vector<8xf32>
    %cst_15 = arith.constant 1.440000e+03 : f32
    %49 = vector.broadcast %cst_15 : f32 to vector<8xf32>
    %50 = arith.addf %46, %49 : vector<8xf32>
    %51 = arith.select %48, %50, %46 : vector<8xi1>, vector<8xf32>
    %52 = arith.fptosi %51 : vector<8xf32> to vector<8xi32>
    %c0_16 = arith.constant 0 : index
    %c0_17 = arith.constant 0 : index
    %53 = vector.load %arg6[%c0_16, %c0_17] : memref<1440x32xf32, #tpu.memory_space<vmem>>, vector<1440x32xf32>
    %54 = vector.shape_cast %52 : vector<8xi32> to vector<8x1xi32>
    %55 = tpu.iota {dimensions = array<i32: 1>} : vector<8x1440xi32>
    %56 = vector.broadcast %54 : vector<8x1xi32> to vector<8x1440xi32>
    %57 = arith.cmpi eq, %56, %55 : vector<8x1440xi32>
    %58 = arith.extui %57 : vector<8x1440xi1> to vector<8x1440xi32>
    %59 = arith.sitofp %58 : vector<8x1440xi32> to vector<8x1440xf32>
    %60 = arith.truncf %59 : vector<8x1440xf32> to vector<8x1440xbf16>
    %61 = arith.truncf %53 : vector<1440x32xf32> to vector<1440x32xbf16>
    %cst_18 = arith.constant dense<0.000000e+00> : vector<8x32xf32>
    %62 = tpu.matmul %60, %61, %cst_18 {dimension_numbers = #tpu.dot_dimension_numbers<[1], [0], [0], [1], [0, 0, 1, 1], [], []>} : vector<8x1440xbf16>, vector<1440x32xbf16>, vector<8x32xf32> -> vector<8x32xf32>
    %63 = arith.addf %30, %62 : vector<8x32xf32>
    %64 = vector.extract_strided_slice %1 {offsets = [0, 1], sizes = [8, 1], strides = [1, 1]} : vector<8x8xf32> to vector<8x1xf32>
    %65 = vector.shape_cast %64 : vector<8x1xf32> to vector<8xf32>
    %66 = arith.fptosi %65 : vector<8xf32> to vector<8xi32>
    %c0_19 = arith.constant 0 : index
    %c0_20 = arith.constant 0 : index
    %67 = vector.load %arg7[%c0_19, %c0_20] : memref<52x32xf32, #tpu.memory_space<vmem>>, vector<52x32xf32>
    %68 = vector.shape_cast %66 : vector<8xi32> to vector<8x1xi32>
    %69 = tpu.iota {dimensions = array<i32: 1>} : vector<8x52xi32>
    %70 = vector.broadcast %68 : vector<8x1xi32> to vector<8x52xi32>
    %71 = arith.cmpi eq, %70, %69 : vector<8x52xi32>
    %72 = arith.extui %71 : vector<8x52xi1> to vector<8x52xi32>
    %73 = arith.sitofp %72 : vector<8x52xi32> to vector<8x52xf32>
    %74 = arith.truncf %73 : vector<8x52xf32> to vector<8x52xbf16>
    %75 = arith.truncf %67 : vector<52x32xf32> to vector<52x32xbf16>
    %cst_21 = arith.constant dense<0.000000e+00> : vector<8x32xf32>
    %76 = tpu.matmul %74, %75, %cst_21 {dimension_numbers = #tpu.dot_dimension_numbers<[1], [0], [0], [1], [0, 0, 1, 1], [], []>} : vector<8x52xbf16>, vector<52x32xbf16>, vector<8x32xf32> -> vector<8x32xf32>
    %77 = arith.addf %63, %76 : vector<8x32xf32>
    %78 = vector.shape_cast %77 : vector<8x32xf32> to vector<1x8x32xf32>
    %c0_22 = arith.constant 0 : index
    %c0_23 = arith.constant 0 : index
    %c0_24 = arith.constant 0 : index
    %79 = vector.load %arg8[%c0_22, %c0_23, %c0_24] : memref<1x8x32xf32, #tpu.memory_space<vmem>>, vector<1x8x32xf32>
    tpu.vector_store %arg8[%c0_22, %c0_23, %c0_24], %78 {strides = array<i32>} : memref<1x8x32xf32, #tpu.memory_space<vmem>>, vector<1x8x32xf32>,
    return
  }
  func.func @transform_0(%arg0: i32, %arg1: i32) -> (i32, i32, i32) {
    %c0_i32 = arith.constant 0 : i32
    %c0_i32_0 = arith.constant 0 : i32
    return %arg0, %arg1, %c0_i32 : i32, i32, i32
  }
  func.func @transform_1(%arg0: i32, %arg1: i32) -> (i32, i32) {
    %c0_i32 = arith.constant 0 : i32
    %c0_i32_0 = arith.constant 0 : i32
    %c0_i32_1 = arith.constant 0 : i32
    return %c0_i32, %c0_i32_0 : i32, i32
  }
  func.func @transform_2(%arg0: i32, %arg1: i32) -> (i32, i32) {
    %c0_i32 = arith.constant 0 : i32
    %c0_i32_0 = arith.constant 0 : i32
    %c0_i32_1 = arith.constant 0 : i32
    return %c0_i32, %c0_i32_0 : i32, i32
  }
  func.func @transform_3(%arg0: i32, %arg1: i32) -> (i32, i32) {
    %c0_i32 = arith.constant 0 : i32
    %c0_i32_0 = arith.constant 0 : i32
    %c0_i32_1 = arith.constant 0 : i32
    return %c0_i32, %c0_i32_0 : i32, i32
  }
  func.func @transform_4(%arg0: i32, %arg1: i32) -> (i32, i32) {
    %c0_i32 = arith.constant 0 : i32
    %c0_i32_0 = arith.constant 0 : i32
    %c0_i32_1 = arith.constant 0 : i32
    return %c0_i32, %c0_i32_0 : i32, i32
  }
  func.func @transform_5(%arg0: i32, %arg1: i32) -> (i32, i32) {
    %c0_i32 = arith.constant 0 : i32
    %c0_i32_0 = arith.constant 0 : i32
    %c0_i32_1 = arith.constant 0 : i32
    return %c0_i32, %c0_i32_0 : i32, i32
  }
  func.func @transform_6(%arg0: i32, %arg1: i32) -> (i32, i32, i32) {
    %c0_i32 = arith.constant 0 : i32
    %c0_i32_0 = arith.constant 0 : i32
    return %arg0, %arg1, %c0_i32 : i32, i32, i32
  }
}

</mosaic_0001>

<bundles_post_ra>
// kernel: tpu_custom_call.1
= control target key start
LH: loop header
LB: loop body
LE: loop exit
PB: predicated region body
PF: predicated region fallthrough
CT: control target
= control target key end

     0   :  { %11 = vsyncpa [#allocation3], 0  ;;  %s2320_s0 = inlined_call_operand.vmem [shape: f32[2,8,8], index: 0, kind: input, shape index: {}]   ;;  %s2321_s1 = inlined_call_operand.vmem [shape: f32[8,32], index: 1, kind: input, shape index: {}]   ;;  %s2322_s2 = inlined_call_operand.vmem [shape: f32[24,32], index: 2, kind: input, shape index: {}]   ;;  %s2323_s3 = inlined_call_operand.vmem [shape: f32[7,32], index: 3, kind: input, shape index: {}]   ;;  %s2324_s4 = inlined_call_operand.vmem [shape: f32[1440,32], index: 4, kind: input, shape index: {}]   ;;  %s2325_s5 = inlined_call_operand.vmem [shape: f32[52,32], index: 5, kind: input, shape index: {}]   ;;  %s2326_s6 = inlined_call_operand.hbm [shape: f32[2,8,32], index: 6, kind: output, shape index: {}]  }
   0x1   :  { %13 = vsyncpa [#allocation3 + $0x1], 0  ;;  %s1546_s21 = smov 0   ;;  %s1548_s22 = smov 0  }
   0x2   :  { %s1550_s23 = smov 0   ;;  %s1552_s24 = smov 0  }
   0x3   :  { %s1554_s25 = smov 0   ;;  %s1556_s26 = smov 0  }
   0x4 LB: > { %s1145_s27 = sadd.s32 4294967295, %s1500_s26   ;;  %s1146_s28 = sadd.s32 4294967294, %s1500_s26   ;;  %s1500_s26 = sphi %s1556_s26, %s19_s26   ;;  %s1496_s25 = sphi %s1554_s25, %s2337_s25   ;;  %s1492_s24 = sphi %s1552_s24, %s2336_s24   ;;  %s1488_s23 = sphi %s1550_s23, %s2335_s23   ;;  %s1484_s22 = sphi %s1548_s22, %s2334_s22   ;;  %s1480_s21 = sphi %s1546_s21, %s2333_s21  }
   0x5   : > { %s31_s29 = sadd.s32 1, %s1496_s25  ;;  %s173_s30 = sadd.s32 1, %s1488_s23 }
   0x6   : > { %p33_p0 = scmp.ge.s32.totalorder %s31_s29, 2  ;;  %p183_p1 = scmp.ne.s32.totalorder %s1488_s23, %s1484_s22 }
   0x7   : > { %p184_p2 = scmp.eq.s32.totalorder %s1145_s27, 1  ;;  %p189_p3 = scmp.ne.s32.totalorder %s1484_s22, %s1480_s21 }
   0x8   : > { %s2339_s29 = smov (%p33_p0, %s31_s29), 0  ;;  %p190_p5 = scmp.eq.s32.totalorder %s1146_s28, 1 }
   0x9   : > { %p1586_p4 = por %p184_p2, %p183_p1  ;;  %s168_s8 = ssub.s32 %s1496_s25, %s2339_s29 }
   0xa   : > { %p1149_p6 = scmp.ge.s32.totalorder %s1500_s26, 1  ;;  %p171_p7 = scmp.eq.s32.totalorder %s168_s8, 0 }
   0xb   : > { %p1593_p8 = por %p190_p5, %p189_p3  ;;  %p233_p9 = scmp.lt.s32.totalorder %s1500_s26, 3 }
   0xc   : > { %s1599_s10 = scalar_select %p171_p7, %s1488_s23, %s173_s30  }
   0xd   : > { %p234_p10 = pnand %p1149_p6, %p233_p9 }
   0xe   : > { %p265_p11 = scmp.lt.s32.totalorder (!%p234_p10), %s1492_s24, 1  ;;  %v1502_v0 = vmov (!%p234_p10), 5   ;;  %v1503_v1 = vmov (!%p234_p10), 7   ;;  %v1504_v2 = vmov (!%p234_p10), 0.0   ;;  %v339_v4 = vld [vmem:[%s2323_s3] sm:$0x7f] (!%p234_p10)  ;;  %v279_v38 = vlaneseq (!%p234_p10) }
   0xf   : > { %237 = sbr.rel (%p234_p10) target bundleno = 503 (0x1f7), region = 44  ;;  %1417 = vset.pattern.permute.xlu0 (!%p234_p10), %v1502_v0  ;;  %1419 = vset.pattern.permute.xlu1 (!%p234_p10), %v1503_v1  ;;  %vm352_vm0 = vcmask (!%p234_p10), 1042432   ;;  %vm294_vm1 = vcmask (!%p234_p10), 1043456   ;;  %v347_v7 = vpack.c.bf16 (!%p234_p10), %v339_v4, %v339_v4  ;;  %v1505_v8 = vmov (!%p234_p10), 65535   ;;  %v276_v13 = vld [vmem:[%s2322_s2] sm:$0xff] (!%p234_p10)  ;;  %v277_v14 = vld [vmem:[%s2322_s2 + $0x8] sm:$0xff] (!%p234_p10) }
  0x10   : > { %1326 = vmatprep.subr.bf16.mxu1 (!%p234_p10), %v1504_v2  ;;  %1318 = vmatprep.subr.bf16.mxu0 (!%p234_p10), %v1504_v2  ;;  %v353_v9 = vsel (!%p234_p10), %vm352_vm0, 4294967295, %v1505_v8  ;;  %v288_v16 = vpack.c.bf16 (!%p234_p10), %v277_v14, %v276_v13  ;;  %v430_v18 = vld [vmem:[%s2324_s4 + $0x80] sm:$0xff] (!%p234_p10)  ;;  %v431_v19 = vld [vmem:[%s2324_s4 + $0x88] sm:$0xff] (!%p234_p10)  ;;  %v278_v22 = vld [vmem:[%s2322_s2 + $0x10] sm:$0xff] (!%p234_p10)  ;;  %vm1506_vm2 = vmmov (!%p234_p10), 0   ;;  %v1507_v25 = vmov (!%p234_p10), 0  }
  0x11   : > { %v354_v12 = vsel (!%p234_p10), %vm294_vm1, %v353_v9, 0  ;;  %v664_v20 = vpack.c.bf16 (!%p234_p10), %v431_v19, %v430_v18  ;;  %1328 = vmatprep.mubr.msk.bf16.mxu1 (!%p234_p10), %vm1506_vm2, %v1504_v2  ;;  %v289_v23 = vpack.c.bf16 (!%p234_p10), %v278_v22, %v278_v22  ;;  %1322 = vmatprep.mubr.msk.bf16.mxu0 (!%p234_p10), %vm1506_vm2, %v1504_v2  ;;  %v462_v28 = vld [vmem:[%s2324_s4 + $0x180] sm:$0xff] (!%p234_p10)  ;;  %v463_v29 = vld [vmem:[%s2324_s4 + $0x188] sm:$0xff] (!%p234_p10)  ;;  %v1508_v32 = vmov (!%p234_p10), 1   ;;  %v432_v43 = vld [vmem:[%s2324_s4 + $0x90] sm:$0xff] (!%p234_p10)  ;;  %s262_s28 = sand.u32 (!%p234_p10), 1, %s1484_s22  }
  0x12   : > { %v356_v15 = vand.u32 (!%p234_p10), %v354_v12, %v347_v7  ;;  %1319 = vmatpush3.bf16.msra.mxu0 (!%p234_p10), %v288_v16  ;;  %v680_v31 = vpack.c.bf16 (!%p234_p10), %v463_v29, %v462_v28  ;;  %v1640_v39 = vand.u32 (!%p234_p10), 127, %v279_v38  ;;  %v414_v40 = vld [vmem:[%s2324_s4] sm:$0xff] (!%p234_p10)  ;;  %v415_v41 = vld [vmem:[%s2324_s4 + $0x8] sm:$0xff] (!%p234_p10)  ;;  %v433_v44 = vld [vmem:[%s2324_s4 + $0x98] sm:$0xff] (!%p234_p10)  ;;  %vm348_vm6 = vcmask (!%p234_p10), 56320   ;;  %s1150_s30 = sshll.u32 (!%p234_p10), %s262_s28, 3 }
  0x13   : > { %1320 = vmatprep.subr.bf16.mxu0 (!%p234_p10), %v1504_v2  ;;  %v296_v26 = vsel (!%p234_p10), %vm294_vm1, %v289_v23, 0  ;;  %v656_v46 = vpack.c.bf16 (!%p234_p10), %v415_v41, %v414_v40  ;;  %v665_v48 = vpack.c.bf16 (!%p234_p10), %v433_v44, %v432_v43  ;;  %v416_v49 = vld [vmem:[%s2324_s4 + $0x10] sm:$0xff] (!%p234_p10)  ;;  %v417_v50 = vld [vmem:[%s2324_s4 + $0x18] sm:$0xff] (!%p234_p10)  ;;  %v446_v51 = vld [vmem:[%s2324_s4 + $0x100] sm:$0xff] (!%p234_p10)  ;;  %vm290_vm8 = vcmask (!%p234_p10), 195584   ;;  %s1195_s8 = sshll.u32 (!%p234_p10), %s1492_s24, 7 }
  0x14   : > { %1327 = vmatpush3.bf16.msra.mxu1 (!%p234_p10), %v356_v15  ;;  %v447_v52 = vld [vmem:[%s2324_s4 + $0x108] sm:$0xff] (!%p234_p10)  ;;  %v434_v53 = vld [vmem:[%s2324_s4 + $0xa0] sm:$0xff] (!%p234_p10)  ;;  %v464_v56 = vld [vmem:[%s2324_s4 + $0x190] sm:$0xff] (!%p234_p10)  ;;  %v657_v58 = vpack.c.bf16 (!%p234_p10), %v417_v50, %v416_v49  ;;  %v594_v29 = vadd.s32 (!%p234_p10), 128, %v1640_v39  ;;  %v1509_v50 = vmov (!%p234_p10), 1.0|1.0  }
  0x15   : > { %1203 = vmatprep.subr.bf16.mxu1 (!%p234_p10), %v664_v20  ;;  %v435_v54 = vld [vmem:[%s2324_s4 + $0xa8] sm:$0xff] (!%p234_p10)  ;;  %v465_v57 = vld [vmem:[%s2324_s4 + $0x198] sm:$0xff] (!%p234_p10)  ;;  %v672_v60 = vpack.c.bf16 (!%p234_p10), %v447_v52, %v446_v51  ;;  %v418_v62 = vld [vmem:[%s2324_s4 + $0x20] sm:$0xff] (!%p234_p10)  ;;  %s1510_s17 = smov (!%p234_p10), [#allocation2]  }
  0x16   : > { %s266_s11 = scalar_select %p265_p11, %s1492_s24, 1  ;;  %1321 = vmatpush3.bf16.msra.mxu0 %v296_v26  ;;  %v666_v61 = vpack.c.bf16 %v435_v54, %v434_v53  ;;  %v419_v63 = vld [vmem:[%s2324_s4 + $0x28] sm:$0xff]  ;;  %v448_v0 = vld [vmem:[%s2324_s4 + $0x110] sm:$0xff]  ;;  %v449_v4 = vld [vmem:[%s2324_s4 + $0x118] sm:$0xff] }
  0x17   : > { %1225 = vmatprep.subr.bf16.mxu0 %v680_v31  ;;  %v466_v7 = vld [vmem:[%s2324_s4 + $0x1a0] sm:$0xff]  ;;  %v467_v8 = vld [vmem:[%s2324_s4 + $0x1a8] sm:$0xff]  ;;  %v658_v9 = vpack.c.bf16 %v419_v63, %v418_v62  ;;  %v420_v12 = vld [vmem:[%s2324_s4 + $0x30] sm:$0xff]  ;;  %s1060_s24 = scalar_lea.sflag [#allocation3], %s262_s28  ;;  %s1426_s18 = sshll.u32 %s1510_s17, 4  ;;  %s1427_s18 = int_to_ptr.vmem [resolvable:$false] %s1426_s18 }
  0x18   : > { %s1151_s12 = sshll.u32 %s266_s11, 3  ;;  %v421_v13 = vld [vmem:[%s2324_s4 + $0x38] sm:$0xff]  ;;  %v450_v14 = vld [vmem:[%s2324_s4 + $0x120] sm:$0xff]  ;;  %v682_v15 = vpack.c.bf16 %v467_v8, %v466_v7  ;;  %v451_v16 = vld [vmem:[%s2324_s4 + $0x128] sm:$0xff]  ;;  %s264_s11 = scalar_lea.vmem [#allocation2], %s1150_s30 }
  0x19   : > { %s271_s15 = scalar_lea.vmem %s2320_s0, %s1151_s12  ;;  %v439_v18 = vld [vmem:[%s2324_s4 + $0xc8] sm:$0xff]  ;;  %v468_v19 = vld [vmem:[%s2324_s4 + $0x1b0] sm:$0xff]  ;;  %v469_v20 = vld [vmem:[%s2324_s4 + $0x1b8] sm:$0xff]  ;;  %v674_v23 = vpack.c.bf16 %v451_v16, %v450_v14  ;;  %s1074_s12 = sshll.u32 %s264_s11, 4  ;;  %s2274_s12 = int_to_ptr.vmem [resolvable:$true] %s1074_s12 }
  0x1a   : > { %v273_v3 = vld [vmem:[%s271_s15] sm:$0xff]  ;;  %v423_v26 = vld [vmem:[%s2324_s4 + $0x48] sm:$0xff]  ;;  %v453_v28 = vld [vmem:[%s2324_s4 + $0x138] sm:$0xff]  ;;  %v683_v31 = vpack.c.bf16 %v469_v20, %v468_v19  ;;  %s2272_s15 = scalar_lea.hbm %s2326_s6, %s1195_s8  ;;  %s1422_s16 = scalar_lea.vmem %s2274_s12, 128 }
  0x1b   : > { %v1349_v5 = vtrunc.f32 %v273_v3  ;;  %v400_v6 = vmul.f32 0.016666668, %v273_v3  ;;  %v681_v3 = vpack.c.bf16 %v465_v57, %v464_v56  ;;  %v422_v22 = vld [vmem:[%s2324_s4 + $0x40] sm:$0xff]  ;;  %v424_v38 = vld [vmem:[%s2324_s4 + $0x50] sm:$0xff]  ;;  %v455_v44 = vld [vmem:[%s2324_s4 + $0x148] sm:$0xff]  ;;  %p1423_p12 = scmp.ne.s32.totalorder %s2274_s12, %s1422_s16  ;;  %s1428_s19 = scalar_lea.vmem %s1427_s18, 256 }
  0x1c   : > { %v454_v43 = vld [vmem:[%s2324_s4 + $0x140] sm:$0xff]  ;;  %v473_v49 = vld [vmem:[%s2324_s4 + $0x1d8] sm:$0xff]  ;;  %v456_v56 = vld [vmem:[%s2324_s4 + $0x150] sm:$0xff]  ;;  %p1429_p1 = scmp.lt.s32.totalorder %s2274_s12, %s1427_s18  ;;  %p1430_p2 = scmp.lt.s32.totalorder %s1428_s19, %s1422_s16 }
  0x1d   : > { %v1350_v10 = vcvt.f32.s32 %v1349_v5  ;;  %v1351_v11 = vround.rtne.f32 %v400_v6  ;;  %v436_v5 = vld [vmem:[%s2324_s4 + $0xb0] sm:$0xff]  ;;  %v437_v6 = vld [vmem:[%s2324_s4 + $0xb8] sm:$0xff]  ;;  %v676_v52 = vpack.c.bf16 %v455_v44, %v454_v43  ;;  %v426_v54 = vld [vmem:[%s2324_s4 + $0x60] sm:$0xff]  ;;  %p1424_p13 = pnand %p1423_p12, %p1586_p4 }
  0x1e   : > { %v475_v62 = vld [vmem:[%s2324_s4 + $0x1e8] sm:$0xff]  ;;  %v494_v8 = vld [vmem:[%s2324_s4 + $0x280] sm:$0xff]  ;;  %v461_v20 = vld [vmem:[%s2324_s4 + $0x178] sm:$0xff]  ;;  %p1431_p3 = por %p1430_p2, %p1429_p1 }
  0x1f   : > { %v403_v17 = vmul.f32 0.00069444446, %v1351_v11  ;;  %341 = vperm.xlu0 %1417, %v1350_v10   ;;  %v459_v7 = vld [vmem:[%s2324_s4 + $0x168] sm:$0xff]  ;;  %v478_v16 = vld [vmem:[%s2324_s4 + $0x200] sm:$0xff]  ;;  %v529_v43 = vld [vmem:[%s2324_s4 + $0x398] sm:$0xff]  ;;  %p1425_p0 = pneg %p1424_p13 }
  0x21   : > { %v404_v21 = vfloor.f32 %v403_v17  ;;  %v438_v17 = vld [vmem:[%s2324_s4 + $0xc0] sm:$0xff]  ;;  %p1432_p5 = pnand %p1431_p3, %p1425_p0 }
  0x23   : > { %v405_v24 = vmul.f32 1440.0, %v404_v21  ;;  %1418 = vset.pattern.permute.xlu0 %v1507_v25  ;;  %v659_v21 = vpack.c.bf16 %v421_v13, %v420_v12  ;;  %v477_v12 = vld [vmem:[%s2324_s4 + $0x1f8] sm:$0xff] }
  0x24   : > { %282 = vperm.xlu0 %1418, %v1350_v10  }
  0x25   : > { %v406_v27 = vsub.f32 %v1351_v11, %v405_v24  ;;  %v667_v11 = vpack.c.bf16 %v437_v6, %v436_v5  ;;  %v668_v24 = vpack.c.bf16 %v439_v18, %v438_v17  ;;  %v458_v5 = vld [vmem:[%s2324_s4 + $0x160] sm:$0xff]  ;;  %v479_v17 = vld [vmem:[%s2324_s4 + $0x208] sm:$0xff]  ;;  %v460_v18 = vld [vmem:[%s2324_s4 + $0x170] sm:$0xff] }
  0x26   : > { %v678_v14 = vpack.c.bf16 %v459_v7, %v458_v5  ;;  %v533_v5 = vld [vmem:[%s2324_s4 + $0x3b8] sm:$0xff] }
  0x27   : > { %vm407_vm3 = vcmp.ge.f32.partialorder %v406_v27, 1440.0  ;;  %v1156_v30 = vadd.f32 -1440.0, %v406_v27 }
  0x28   : > { %1421 = vset.pattern.permute.xlu0 %v1508_v32 }
  0x29   : > { %v409_v33 = vsel %vm407_vm3, %v1156_v30, %v406_v27  ;;  %v452_v27 = vld [vmem:[%s2324_s4 + $0x130] sm:$0xff]  ;;  %v596_v30 = vadd.s32 384, %v1640_v39 }
  0x2a   : > { %vm410_vm4 = vcmp.lt.f32.partialorder %v409_v33, 0.0  ;;  %v411_v34 = vadd.f32 1440.0, %v409_v33 }
  0x2c   : > { %v412_v35 = vsel %vm410_vm4, %v411_v34, %v409_v33  ;;  %v441_v33 = vld [vmem:[%s2324_s4 + $0xd8] sm:$0xff]  ;;  %v470_v34 = vld [vmem:[%s2324_s4 + $0x1c0] sm:$0xff] }
  0x2d   : > { %v1352_v36 = vtrunc.f32 %v412_v35  ;;  %v471_v35 = vld [vmem:[%s2324_s4 + $0x1c8] sm:$0xff] }
  0x2f   : > { %v1353_v37 = vcvt.f32.s32 %v1352_v36  ;;  %v660_v36 = vpack.c.bf16 %v423_v26, %v422_v22  ;;  %v497_v22 = vld [vmem:[%s2324_s4 + $0x298] sm:$0xff]  ;;  %v519_v26 = vld [vmem:[%s2324_s4 + $0x348] sm:$0xff] }
  0x31   : > { %606 = vperm.xlu1 %1419, %v1353_v37   ;;  %v675_v37 = vpack.c.bf16 %v453_v28, %v452_v27  ;;  %v688_v27 = vpack.c.bf16 %v479_v17, %v478_v16  ;;  %v595_v28 = vadd.s32 256, %v1640_v39  ;;  %v534_v16 = vld [vmem:[%s2324_s4 + $0x3c0] sm:$0xff]  ;;  %v535_v17 = vld [vmem:[%s2324_s4 + $0x3c8] sm:$0xff] }
  0x35   : > { %1420 = vset.pattern.permute.xlu1 %v1508_v32  ;;  %v440_v32 = vld [vmem:[%s2324_s4 + $0xd0] sm:$0xff] }
  0x36   : > { %999 = vperm.xlu1 %1420, %v1350_v10   ;;  %v673_v10 = vpack.c.bf16 %v449_v4, %v448_v0  ;;  %v669_v41 = vpack.c.bf16 %v441_v33, %v440_v32  ;;  %v429_v4 = vld [vmem:[%s2324_s4 + $0x78] sm:$0xff]  ;;  %v480_v32 = vld [vmem:[%s2324_s4 + $0x210] sm:$0xff] }
  0x37   : > { %v481_v33 = vld [vmem:[%s2324_s4 + $0x218] sm:$0xff] }
  0x38   : > { %v689_v44 = vpack.c.bf16 %v481_v33, %v480_v32 }
  0x9e   : > { %v342_v42 = vpop.permute.xlu0 %341 }
  0x9f   : > { %vm343_vm5 = vcmp.eq.s32.totalorder %v342_v42, %v1640_v39  ;;  %v425_v42 = vld [vmem:[%s2324_s4 + $0x58] sm:$0xff] }
  0xa0   : > { %v1154_v45 = vsel %vm343_vm5, 1.0, %v1504_v2  ;;  %v661_v51 = vpack.c.bf16 %v425_v42, %v424_v38  ;;  %v498_v38 = vld [vmem:[%s2324_s4 + $0x2a0] sm:$0xff]  ;;  %v528_v42 = vld [vmem:[%s2324_s4 + $0x390] sm:$0xff] }
  0xa1   : > { %v346_v47 = vpack.c.bf16 %v1154_v45, %v1154_v45  ;;  %v684_v45 = vpack.c.bf16 %v471_v35, %v470_v34  ;;  %v600_v34 = vadd.s32 896, %v1640_v39 }
  0xa3   : > { %1329 = vmatmul.mubr.msk.bf16.vlgmr.msra.gmra.mrb[0].mxu1 %vm348_vm6, %v346_v47  ;;  %v283_v55 = vpop.permute.xlu0 %282  ;;  %v443_v47 = vld [vmem:[%s2324_s4 + $0xe8] sm:$0xff] }
  0xa4   : > { %1204 = vmatpush3.bf16.msra.mxu1 %v656_v46  ;;  %vm284_vm7 = vcmp.eq.s32.totalorder %v283_v55, %v1640_v39  ;;  %v442_v46 = vld [vmem:[%s2324_s4 + $0xe0] sm:$0xff]  ;;  %v427_v55 = vld [vmem:[%s2324_s4 + $0x68] sm:$0xff] }
  0xa5   : > { %v1152_v59 = vsel %vm284_vm7, 1.0, %v1504_v2  ;;  %1205 = vmatprep.subr.bf16.mxu1 %v665_v48  ;;  %v472_v48 = vld [vmem:[%s2324_s4 + $0x1d0] sm:$0xff]  ;;  %v670_v53 = vpack.c.bf16 %v443_v47, %v442_v46  ;;  %v662_v63 = vpack.c.bf16 %v427_v55, %v426_v54  ;;  %v482_v46 = vld [vmem:[%s2324_s4 + $0x220] sm:$0xff]  ;;  %v483_v47 = vld [vmem:[%s2324_s4 + $0x228] sm:$0xff] }
  0xa6   : > { %v287_v1 = vpack.c.bf16 %v1152_v59, %v1152_v59  ;;  %v685_v57 = vpack.c.bf16 %v473_v49, %v472_v48  ;;  %v444_v59 = vld [vmem:[%s2324_s4 + $0xf0] sm:$0xff]  ;;  %v501_v54 = vld [vmem:[%s2324_s4 + $0x2b8] sm:$0xff]  ;;  %v530_v55 = vld [vmem:[%s2324_s4 + $0x3a0] sm:$0xff] }
  0xa7   : > { %v512_v48 = vld [vmem:[%s2324_s4 + $0x310] sm:$0xff] }
  0xa8   : > { %1206 = vmatpush3.bf16.msra.mxu1 %v657_v58  ;;  %1323 = vmatmul.mubr.msk.bf16.vlgmr.msra.gmra.mrb[0].mxu0 %vm290_vm8, %v287_v1  ;;  %v457_v58 = vld [vmem:[%s2324_s4 + $0x158] sm:$0xff] }
  0xa9   : > { %1226 = vmatpush3.bf16.msra.mxu0 %v672_v60  ;;  %1207 = vmatprep.subr.bf16.mxu1 %v666_v61  ;;  %v445_v60 = vld [vmem:[%s2324_s4 + $0xf8] sm:$0xff]  ;;  %v474_v61 = vld [vmem:[%s2324_s4 + $0x1e0] sm:$0xff]  ;;  %v677_v0 = vpack.c.bf16 %v457_v58, %v456_v56  ;;  %v531_v56 = vld [vmem:[%s2324_s4 + $0x3a8] sm:$0xff] }
  0xaa   : > { %1227 = vmatprep.subr.bf16.mxu0 %v681_v3  ;;  %v671_v1 = vpack.c.bf16 %v445_v60, %v444_v59  ;;  %v428_v3 = vld [vmem:[%s2324_s4 + $0x70] sm:$0xff]  ;;  %v686_v6 = vpack.c.bf16 %v475_v62, %v474_v61  ;;  %v485_v61 = vld [vmem:[%s2324_s4 + $0x238] sm:$0xff]  ;;  %v514_v62 = vld [vmem:[%s2324_s4 + $0x320] sm:$0xff] }
  0xab   : > { %v663_v13 = vpack.c.bf16 %v429_v4, %v428_v3  ;;  %v484_v60 = vld [vmem:[%s2324_s4 + $0x230] sm:$0xff]  ;;  %v503_v3 = vld [vmem:[%s2324_s4 + $0x2c8] sm:$0xff] }
  0xac   : > { %1208 = vmatpush3.bf16.msra.mxu1 %v658_v9  ;;  %v495_v9 = vld [vmem:[%s2324_s4 + $0x288] sm:$0xff]  ;;  %v532_v4 = vld [vmem:[%s2324_s4 + $0x3b0] sm:$0xff] }
  0xad   : > { %1228 = vmatpush3.bf16.msra.mxu0 %v673_v10  ;;  %1209 = vmatprep.subr.bf16.mxu1 %v667_v11  ;;  %v598_v10 = vadd.s32 640, %v1640_v39  ;;  %v476_v11 = vld [vmem:[%s2324_s4 + $0x1f0] sm:$0xff] }
  0xae   : > { %1229 = vmatprep.subr.bf16.mxu0 %v682_v15  ;;  %v696_v15 = vpack.c.bf16 %v495_v9, %v494_v8  ;;  %v687_v19 = vpack.c.bf16 %v477_v12, %v476_v11  ;;  %v486_v9 = vld [vmem:[%s2324_s4 + $0x240] sm:$0xff]  ;;  %v516_v11 = vld [vmem:[%s2324_s4 + $0x330] sm:$0xff]  ;;  %v715_v12 = vpack.c.bf16 %v533_v5, %v532_v4  ;;  %v525_v5 = vld [vmem:[%s2324_s4 + $0x378] sm:$0xff] }
  0xb0   : > { %1210 = vmatpush3.bf16.msra.mxu1 %v659_v21  ;;  %v1759_v40 = vpop.permute.xlu1 %606  ;;  %v496_v21 = vld [vmem:[%s2324_s4 + $0x290] sm:$0xff] }
  0xb1   : > { %1230 = vmatpush3.bf16.msra.mxu0 %v674_v23  ;;  %1211 = vmatprep.subr.bf16.mxu1 %v668_v24  ;;  %vm609_vm9 = vcmp.eq.s32.totalorder %v1759_v40, %v594_v29  ;;  %vm611_vm10 = vcmp.eq.s32.totalorder %v1759_v40, %v596_v30  ;;  %vm608_vm13 = vcmp.eq.s32.totalorder %v1759_v40, %v1640_v39  ;;  %v526_v23 = vld [vmem:[%s2324_s4 + $0x380] sm:$0xff]  ;;  %v527_v24 = vld [vmem:[%s2324_s4 + $0x388] sm:$0xff]  ;;  %v536_v29 = vld [vmem:[%s2324_s4 + $0x3d0] sm:$0xff] }
  0xb2   : > { %1231 = vmatprep.subr.bf16.mxu0 %v683_v31  ;;  %vm1169_vm11 = vmpackc.low %vm609_vm9, %vm609_vm9  ;;  %vm613_vm14 = vcmp.eq.s32.totalorder %v1759_v40, %v598_v10  ;;  %v679_v30 = vpack.c.bf16 %v461_v20, %v460_v18  ;;  %v697_v31 = vpack.c.bf16 %v497_v22, %v496_v21  ;;  %v712_v35 = vpack.c.bf16 %v527_v24, %v526_v23  ;;  %v487_v10 = vld [vmem:[%s2324_s4 + $0x248] sm:$0xff]  ;;  %v488_v21 = vld [vmem:[%s2324_s4 + $0x250] sm:$0xff] }
  0xb3   : > { %1170 = vmatprep.mubr.msk.bf16.mxu1 %vm1169_vm11, %v1509_v50  ;;  %vm1173_vm12 = vmpackc.low %vm611_vm10, %vm611_vm10  ;;  %vm610_vm1 = vcmp.eq.s32.totalorder %v1759_v40, %v595_v28  ;;  %vm615_vm3 = vcmp.eq.s32.totalorder %v1759_v40, %v600_v34  ;;  %v692_v18 = vpack.c.bf16 %v487_v10, %v486_v9  ;;  %v489_v22 = vld [vmem:[%s2324_s4 + $0x258] sm:$0xff]  ;;  %v518_v23 = vld [vmem:[%s2324_s4 + $0x340] sm:$0xff]  ;;  %v716_v24 = vpack.c.bf16 %v535_v17, %v534_v16 }
  0xb4   : > { %1212 = vmatpush3.bf16.msra.mxu1 %v660_v36  ;;  %1174 = vmatprep.mubr.msk.bf16.mxu0 %vm1173_vm12, %v1509_v50  ;;  %vm1862_vm15 = vmpackc.low %vm608_vm13, %vm608_vm13  ;;  %v510_v36 = vld [vmem:[%s2324_s4 + $0x300] sm:$0xff]  ;;  %v507_v28 = vld [vmem:[%s2324_s4 + $0x2e8] sm:$0xff]  ;;  %v708_v32 = vpack.c.bf16 %v519_v26, %v518_v23  ;;  %v599_v9 = vadd.s32 768, %v1640_v39  ;;  %vm746_vm12 = vcmask 261120  }
  0xb5   : > { %1232 = vmatpush3.bf16.msra.mxu0 %v675_v37  ;;  %1213 = vmatprep.subr.bf16.mxu1 %v669_v41  ;;  %vm1867_vm0 = vmpackc.low %vm613_vm14, %vm613_vm14  ;;  %v511_v37 = vld [vmem:[%s2324_s4 + $0x308] sm:$0xff]  ;;  %v490_v34 = vld [vmem:[%s2324_s4 + $0x260] sm:$0xff] }
  0xb6   : > { %1233 = vmatprep.subr.bf16.mxu0 %v684_v45  ;;  %v499_v41 = vld [vmem:[%s2324_s4 + $0x2a8] sm:$0xff]  ;;  %v704_v45 = vpack.c.bf16 %v511_v37, %v510_v36  ;;  %vm1175_vm4 = vmpackc.low %vm610_vm1, %vm610_vm1  ;;  %v520_v36 = vld [vmem:[%s2324_s4 + $0x350] sm:$0xff]  ;;  %vm614_vm11 = vcmp.eq.s32.totalorder %v1759_v40, %v599_v9 }
  0xb7   : > { %v698_v49 = vpack.c.bf16 %v499_v41, %v498_v38  ;;  %vm1181_vm5 = vmpackc.low %vm615_vm3, %vm615_vm3  ;;  %v521_v38 = vld [vmem:[%s2324_s4 + $0x358] sm:$0xff]  ;;  %v508_v41 = vld [vmem:[%s2324_s4 + $0x2f0] sm:$0xff] }
  0xb8   : > { %1214 = vmatpush3.bf16.msra.mxu1 %v661_v51  ;;  %v713_v51 = vpack.c.bf16 %v529_v43, %v528_v42  ;;  %v509_v42 = vld [vmem:[%s2324_s4 + $0x2f8] sm:$0xff]  ;;  %v538_v43 = vld [vmem:[%s2324_s4 + $0x3e0] sm:$0xff]  ;;  %v563_v17 = vld [vmem:[%s2324_s4 + $0x4a8] sm:$0xff] }
  0xb9   : > { %1234 = vmatpush3.bf16.msra.mxu0 %v676_v52  ;;  %1215 = vmatprep.subr.bf16.mxu1 %v670_v53  ;;  %v513_v52 = vld [vmem:[%s2324_s4 + $0x318] sm:$0xff]  ;;  %v500_v53 = vld [vmem:[%s2324_s4 + $0x2b0] sm:$0xff]  ;;  %v562_v16 = vld [vmem:[%s2324_s4 + $0x4a0] sm:$0xff] }
  0xba   : > { %1235 = vmatprep.subr.bf16.mxu0 %v685_v57  ;;  %v690_v57 = vpack.c.bf16 %v483_v47, %v482_v46  ;;  %v705_v58 = vpack.c.bf16 %v513_v52, %v512_v48  ;;  %v699_v59 = vpack.c.bf16 %v501_v54, %v500_v53  ;;  %v709_v46 = vpack.c.bf16 %v521_v38, %v520_v36  ;;  %v492_v48 = vld [vmem:[%s2324_s4 + $0x270] sm:$0xff]  ;;  %v523_v53 = vld [vmem:[%s2324_s4 + $0x368] sm:$0xff]  ;;  %v558_v54 = vld [vmem:[%s2324_s4 + $0x480] sm:$0xff] }
  0xbb   : > { %v703_v47 = vpack.c.bf16 %v509_v42, %v508_v41  ;;  %v576_v23 = vld [vmem:[%s2324_s4 + $0x510] sm:$0xff]  ;;  %v577_v26 = vld [vmem:[%s2324_s4 + $0x518] sm:$0xff]  ;;  %vm1183_vm13 = vmpackc.low %vm614_vm11, %vm614_vm11 }
  0xbc   : > { %1216 = vmatpush3.bf16.msra.mxu1 %v662_v63  ;;  %v714_v63 = vpack.c.bf16 %v531_v56, %v530_v55  ;;  %v559_v55 = vld [vmem:[%s2324_s4 + $0x488] sm:$0xff]  ;;  %v597_v56 = vadd.s32 512, %v1640_v39  ;;  %v556_v9 = vld [vmem:[%s2324_s4 + $0x470] sm:$0xff] }
  0xbd   : > { %1236 = vmatpush3.bf16.msra.mxu0 %v677_v0  ;;  %1217 = vmatprep.subr.bf16.mxu1 %v671_v1  ;;  %v515_v0 = vld [vmem:[%s2324_s4 + $0x328] sm:$0xff]  ;;  %v502_v1 = vld [vmem:[%s2324_s4 + $0x2c0] sm:$0xff] }
  0xbe   : > { %1237 = vmatprep.subr.bf16.mxu0 %v686_v6  ;;  %v691_v6 = vpack.c.bf16 %v485_v61, %v484_v60  ;;  %v706_v7 = vpack.c.bf16 %v515_v0, %v514_v62  ;;  %v700_v8 = vpack.c.bf16 %v503_v3, %v502_v1  ;;  %v602_v60 = vadd.s32 1152, %v1640_v39  ;;  %v543_v0 = vld [vmem:[%s2324_s4 + $0x408] sm:$0xff]  ;;  %v524_v1 = vld [vmem:[%s2324_s4 + $0x370] sm:$0xff] }
  0xbf   : > { %v728_v62 = vpack.c.bf16 %v559_v55, %v558_v54  ;;  %v604_v3 = vadd.s32 1408, %v1640_v39  ;;  %vm612_vm6 = vcmp.eq.s32.totalorder %v1759_v40, %v597_v56  ;;  %v711_v10 = vpack.c.bf16 %v525_v5, %v524_v1  ;;  %v579_v36 = vld [vmem:[%s2324_s4 + $0x528] sm:$0xff]  ;;  %v552_v54 = vld [vmem:[%s2324_s4 + $0x450] sm:$0xff]  ;;  %v553_v55 = vld [vmem:[%s2324_s4 + $0x458] sm:$0xff] }
  0xc0   : > { %1218 = vmatpush3.bf16.msra.mxu1 %v663_v13  ;;  %v517_v13 = vld [vmem:[%s2324_s4 + $0x338] sm:$0xff]  ;;  %vm617_vm7 = vcmp.eq.s32.totalorder %v1759_v40, %v602_v60  ;;  %vm1179_vm9 = vmpackc.low %vm612_vm6, %vm612_vm6  ;;  %v567_v38 = vld [vmem:[%s2324_s4 + $0x4c8] sm:$0xff]  ;;  %v725_v60 = vpack.c.bf16 %v553_v55, %v552_v54 }
  0xc1   : > { %1238 = vmatpush3.bf16.msra.mxu0 %v678_v14  ;;  %1247 = vmatprep.subr.bf16.mxu1 %v696_v15  ;;  %v504_v14 = vld [vmem:[%s2324_s4 + $0x2d0] sm:$0xff]  ;;  %v505_v15 = vld [vmem:[%s2324_s4 + $0x2d8] sm:$0xff]  ;;  %vm619_vm8 = vcmp.eq.s32.totalorder %v1759_v40, %v604_v3  ;;  %vm1185_vm10 = vmpackc.low %vm617_vm7, %vm617_vm7 }
  0xc2   : > { %1239 = vmatprep.subr.bf16.mxu0 %v687_v19  ;;  %v707_v19 = vpack.c.bf16 %v517_v13, %v516_v11  ;;  %v701_v20 = vpack.c.bf16 %v505_v15, %v504_v14  ;;  %v545_v13 = vld [vmem:[%s2324_s4 + $0x418] sm:$0xff]  ;;  %v574_v14 = vld [vmem:[%s2324_s4 + $0x500] sm:$0xff]  ;;  %v575_v15 = vld [vmem:[%s2324_s4 + $0x508] sm:$0xff] }
  0xc3   : > { %1172 = vmatmul.mubr.msk.bf16.vlgmr.msra.gmra.mrb[4].mxu1 %vm1862_vm15, %v1509_v50  ;;  %v582_v56 = vld [vmem:[%s2324_s4 + $0x540] sm:$0xff]  ;;  %v584_v1 = vld [vmem:[%s2324_s4 + $0x550] sm:$0xff]  ;;  %v585_v3 = vld [vmem:[%s2324_s4 + $0x558] sm:$0xff] }
  0xc4   : > { %1248 = vmatpush3.bf16.msra.mxu1 %v688_v27  ;;  %1178 = vmatprep.mubr.msk.bf16.mxu1 %vm1867_vm0, %v1509_v50  ;;  %v506_v27 = vld [vmem:[%s2324_s4 + $0x2e0] sm:$0xff]  ;;  %v573_v5 = vld [vmem:[%s2324_s4 + $0x4f8] sm:$0xff]  ;;  %vm1013_vm0 = vcmask 1041408  }
  0xc5   : > { %1240 = vmatpush3.bf16.msra.mxu0 %v679_v30  ;;  %1249 = vmatprep.subr.bf16.mxu1 %v697_v31  ;;  %v537_v30 = vld [vmem:[%s2324_s4 + $0x3d8] sm:$0xff]  ;;  %v693_v31 = vpack.c.bf16 %v489_v22, %v488_v21  ;;  %v702_v33 = vpack.c.bf16 %v507_v28, %v506_v27  ;;  %v546_v21 = vld [vmem:[%s2324_s4 + $0x420] sm:$0xff]  ;;  %v547_v22 = vld [vmem:[%s2324_s4 + $0x428] sm:$0xff] }
  0xc6   : > { %1269 = vmatprep.subr.bf16.mxu0 %v712_v35  ;;  %v491_v35 = vld [vmem:[%s2324_s4 + $0x268] sm:$0xff]  ;;  %v717_v37 = vpack.c.bf16 %v537_v30, %v536_v29  ;;  %v564_v27 = vld [vmem:[%s2324_s4 + $0x4b0] sm:$0xff]  ;;  %v565_v28 = vld [vmem:[%s2324_s4 + $0x4b8] sm:$0xff]  ;;  %v722_v30 = vpack.c.bf16 %v547_v22, %v546_v21 }
  0xc7   : > { %v993_v22 = vld [vmem:[%s2325_s5 + $0x10] sm:$0xff] }
  0xc8   : > { %1176 = vmatmul.mubr.msk.bf16.vlgmr.msra.gmra.mrb[4].mxu0 %vm1175_vm4, %v1509_v50  ;;  %1250 = vmatpush3.bf16.msra.mxu1 %v689_v44  ;;  %v539_v44 = vld [vmem:[%s2324_s4 + $0x3e8] sm:$0xff]  ;;  %vm1009_vm4 = vcmask 424960  }
  0xc9   : > { %1270 = vmatpush3.bf16.msra.mxu0 %v704_v45  ;;  %1182 = vmatprep.mubr.msk.bf16.mxu0 %vm1181_vm5, %v1509_v50  ;;  %v694_v45 = vpack.c.bf16 %v491_v35, %v490_v34  ;;  %v718_v52 = vpack.c.bf16 %v539_v44, %v538_v43  ;;  %v549_v34 = vld [vmem:[%s2324_s4 + $0x438] sm:$0xff]  ;;  %v578_v35 = vld [vmem:[%s2324_s4 + $0x520] sm:$0xff] }
  0xca   : > { %1251 = vmatprep.subr.bf16.mxu1 %v698_v49  ;;  %1271 = vmatprep.subr.bf16.mxu0 %v713_v51  ;;  %v493_v49 = vld [vmem:[%s2324_s4 + $0x278] sm:$0xff]  ;;  %v522_v51 = vld [vmem:[%s2324_s4 + $0x360] sm:$0xff]  ;;  %v738_v42 = vpack.c.bf16 %v579_v36, %v578_v35  ;;  %v603_v36 = vadd.s32 1280, %v1640_v39 }
  0xcb   : > { %v710_v61 = vpack.c.bf16 %v523_v53, %v522_v51  ;;  %v550_v44 = vld [vmem:[%s2324_s4 + $0x440] sm:$0xff] }
  0xcc   : > { %1252 = vmatpush3.bf16.msra.mxu1 %v690_v57  ;;  %v540_v57 = vld [vmem:[%s2324_s4 + $0x3f0] sm:$0xff]  ;;  %vm618_vm1 = vcmp.eq.s32.totalorder %v1759_v40, %v603_v36 }
  0xcd   : > { %1272 = vmatpush3.bf16.msra.mxu0 %v705_v58  ;;  %1253 = vmatprep.subr.bf16.mxu1 %v699_v59  ;;  %v541_v58 = vld [vmem:[%s2324_s4 + $0x3f8] sm:$0xff]  ;;  %v695_v59 = vpack.c.bf16 %v493_v49, %v492_v48  ;;  %v568_v48 = vld [vmem:[%s2324_s4 + $0x4d0] sm:$0xff]  ;;  %vm1190_vm3 = vmpackc.low %vm618_vm1, %vm618_vm1 }
  0xce   : > { %1273 = vmatprep.subr.bf16.mxu0 %v714_v63  ;;  %v542_v63 = vld [vmem:[%s2324_s4 + $0x400] sm:$0xff]  ;;  %v719_v4 = vpack.c.bf16 %v541_v58, %v540_v57  ;;  %v569_v49 = vld [vmem:[%s2324_s4 + $0x4d8] sm:$0xff]  ;;  %v583_v57 = vld [vmem:[%s2324_s4 + $0x548] sm:$0xff] }
  0xcf   : > { %v733_v53 = vpack.c.bf16 %v569_v49, %v568_v48  ;;  %v570_v58 = vld [vmem:[%s2324_s4 + $0x4e0] sm:$0xff] }
  0xd0   : > { %1254 = vmatpush3.bf16.msra.mxu1 %v691_v6  ;;  %v560_v6 = vld [vmem:[%s2324_s4 + $0x490] sm:$0xff] }
  0xd1   : > { %1274 = vmatpush3.bf16.msra.mxu0 %v706_v7  ;;  %1255 = vmatprep.subr.bf16.mxu1 %v700_v8  ;;  %v561_v7 = vld [vmem:[%s2324_s4 + $0x498] sm:$0xff]  ;;  %v720_v8 = vpack.c.bf16 %v543_v0, %v542_v63  ;;  %v554_v63 = vld [vmem:[%s2324_s4 + $0x460] sm:$0xff]  ;;  %v555_v0 = vld [vmem:[%s2324_s4 + $0x468] sm:$0xff] }
  0xd2   : > { %1275 = vmatprep.subr.bf16.mxu0 %v715_v12  ;;  %v729_v11 = vpack.c.bf16 %v561_v7, %v560_v6  ;;  %v544_v12 = vld [vmem:[%s2324_s4 + $0x410] sm:$0xff]  ;;  %v726_v6 = vpack.c.bf16 %v555_v0, %v554_v63  ;;  %v741_v7 = vpack.c.bf16 %v585_v3, %v584_v1 }
  0xd4   : > { %1256 = vmatpush3.bf16.msra.mxu1 %v692_v18  ;;  %v721_v18 = vpack.c.bf16 %v545_v13, %v544_v12  ;;  %v587_v12 = vld [vmem:[%s2324_s4 + $0x568] sm:$0xff]  ;;  %v601_v13 = vadd.s32 1024, %v1640_v39 }
  0xd5   : > { %1276 = vmatpush3.bf16.msra.mxu0 %v707_v19  ;;  %1257 = vmatprep.subr.bf16.mxu1 %v701_v20  ;;  %v1168_v19 = vsel %vm619_vm8, 1.0, %v1504_v2  ;;  %v736_v20 = vpack.c.bf16 %v575_v15, %v574_v14 }
  0xd6   : > { %1277 = vmatprep.subr.bf16.mxu0 %v716_v24  ;;  %v730_v24 = vpack.c.bf16 %v563_v17, %v562_v16  ;;  %v655_v29 = vpack.c.bf16 %v1168_v19, %v1168_v19  ;;  %v991_v16 = vld [vmem:[%s2325_s5] sm:$0xff]  ;;  %v992_v17 = vld [vmem:[%s2325_s5 + $0x8] sm:$0xff]  ;;  %v589_v19 = vld [vmem:[%s2324_s4 + $0x578] sm:$0xff]  ;;  %vm616_vm14 = vcmp.eq.s32.totalorder %v1759_v40, %v601_v13 }
  0xd7   : > { %vm1187_vm15 = vmpackc.low %vm616_vm14, %vm616_vm14 }
  0xd8   : > { %1258 = vmatpush3.bf16.msra.mxu1 %v693_v31  ;;  %v737_v31 = vpack.c.bf16 %v577_v26, %v576_v23  ;;  %v994_v23 = vld [vmem:[%s2325_s5 + $0x18] sm:$0xff]  ;;  %v591_v26 = vld [vmem:[%s2324_s4 + $0x588] sm:$0xff] }
  0xd9   : > { %1278 = vmatpush3.bf16.msra.mxu0 %v708_v32  ;;  %1259 = vmatprep.subr.bf16.mxu1 %v702_v33  ;;  %v731_v32 = vpack.c.bf16 %v565_v28, %v564_v27  ;;  %v548_v33 = vld [vmem:[%s2324_s4 + $0x430] sm:$0xff]  ;;  %v1006_v27 = vpack.c.bf16 %v994_v23, %v993_v22 }
  0xda   : > { %1279 = vmatprep.subr.bf16.mxu0 %v717_v37  ;;  %v566_v37 = vld [vmem:[%s2324_s4 + $0x4c0] sm:$0xff]  ;;  %v723_v41 = vpack.c.bf16 %v549_v34, %v548_v33  ;;  %v1000_v33 = vpop.permute.xlu1 %999  ;;  %v997_v34 = vld [vmem:[%s2325_s5 + $0x30] sm:$0xf] }
  0xdb   : > { %v732_v43 = vpack.c.bf16 %v567_v38, %v566_v37  ;;  %v1008_v38 = vpack.c.bf16 %v997_v34, %v997_v34 }
  0xdc   : > { %1260 = vmatpush3.bf16.msra.mxu1 %v694_v45  ;;  %v551_v45 = vld [vmem:[%s2324_s4 + $0x448] sm:$0xff] }
  0xdd   : > { %1280 = vmatpush3.bf16.msra.mxu0 %v709_v46  ;;  %1261 = vmatprep.subr.bf16.mxu1 %v703_v47  ;;  %v580_v46 = vld [vmem:[%s2324_s4 + $0x530] sm:$0xff]  ;;  %v581_v47 = vld [vmem:[%s2324_s4 + $0x538] sm:$0xff]  ;;  %v724_v51 = vpack.c.bf16 %v551_v45, %v550_v44 }
  0xde   : > { %1281 = vmatprep.subr.bf16.mxu0 %v718_v52  ;;  %v739_v52 = vpack.c.bf16 %v581_v47, %v580_v46  ;;  %v274_v46 = vld [vmem:[%s2321_s1] sm:$0xff] }
  0xe0   : > { %1262 = vmatpush3.bf16.msra.mxu1 %v695_v59  ;;  %v571_v59 = vld [vmem:[%s2324_s4 + $0x4e8] sm:$0xff] }
  0xe1   : > { %1282 = vmatpush3.bf16.msra.mxu0 %v710_v61  ;;  %1291 = vmatprep.subr.bf16.mxu1 %v728_v62  ;;  %v740_v61 = vpack.c.bf16 %v583_v57, %v582_v56  ;;  %v734_v62 = vpack.c.bf16 %v571_v59, %v570_v58 }
  0xe2   : > { %1283 = vmatprep.subr.bf16.mxu0 %v719_v4  ;;  %v572_v4 = vld [vmem:[%s2324_s4 + $0x4f0] sm:$0xff] }
  0xe3   : > { %1180 = vmatmul.mubr.msk.bf16.vlgmr.msra.gmra.mrb[8].mxu1 %vm1179_vm9, %v1509_v50 }
  0xe4   : > { %1292 = vmatpush3.bf16.msra.mxu1 %v720_v8  ;;  %1186 = vmatprep.mubr.msk.bf16.mxu1 %vm1185_vm10, %v1509_v50  ;;  %v735_v8 = vpack.c.bf16 %v573_v5, %v572_v4 }
  0xe5   : > { %1284 = vmatpush3.bf16.msra.mxu0 %v711_v10  ;;  %1293 = vmatprep.subr.bf16.mxu1 %v729_v11  ;;  %v557_v10 = vld [vmem:[%s2324_s4 + $0x478] sm:$0xff]  ;;  %v586_v11 = vld [vmem:[%s2324_s4 + $0x560] sm:$0xff] }
  0xe6   : > { %950 = vmatprep.subr.bf16.mxu0 %v1507_v25  ;;  %v727_v14 = vpack.c.bf16 %v557_v10, %v556_v9  ;;  %v742_v15 = vpack.c.bf16 %v587_v12, %v586_v11 }
  0xe8   : > { %1184 = vmatmul.mubr.msk.bf16.vlgmr.msra.gmra.mrb[8].mxu0 %vm1183_vm13, %v1509_v50  ;;  %1294 = vmatpush3.bf16.msra.mxu1 %v721_v18  ;;  %v588_v18 = vld [vmem:[%s2324_s4 + $0x570] sm:$0xff] }
  0xe9   : > { %951 = vmatpush1.bf16.msra.mxu0 %v736_v20  ;;  %1189 = vmatprep.mubr.msk.bf16.mxu0 %vm746_vm12, %v655_v29  ;;  %v1005_v20 = vpack.c.bf16 %v992_v17, %v991_v16  ;;  %v743_v21 = vpack.c.bf16 %v589_v19, %v588_v18  ;;  %v995_v29 = vld [vmem:[%s2325_s5 + $0x20] sm:$0xff] }
  0xea   : > { %1295 = vmatprep.subr.bf16.mxu1 %v730_v24  ;;  %952 = vmatprep.subr.bf16.mxu0 %v1507_v25  ;;  %v590_v24 = vld [vmem:[%s2324_s4 + $0x580] sm:$0xff] }
  0xeb   : > { %v744_v28 = vpack.c.bf16 %v591_v26, %v590_v24 }
  0xec   : > { %1296 = vmatpush3.bf16.msra.mxu1 %v722_v30  ;;  %v996_v30 = vld [vmem:[%s2325_s5 + $0x28] sm:$0xff] }
  0xed   : > { %953 = vmatpush1.bf16.msra.mxu0 %v737_v31  ;;  %1297 = vmatprep.subr.bf16.mxu1 %v731_v32  ;;  %v592_v31 = vld [vmem:[%s2324_s4 + $0x590] sm:$0xff]  ;;  %v593_v32 = vld [vmem:[%s2324_s4 + $0x598] sm:$0xff]  ;;  %v1007_v35 = vpack.c.bf16 %v996_v30, %v995_v29 }
  0xee   : > { %954 = vmatprep.subr.bf16.mxu0 %v1507_v25  ;;  %v745_v37 = vpack.c.bf16 %v593_v32, %v592_v31 }
  0xf0   : > { %1298 = vmatpush3.bf16.msra.mxu1 %v723_v41 }
  0xf1   : > { %955 = vmatpush1.bf16.msra.mxu0 %v738_v42  ;;  %1299 = vmatprep.subr.bf16.mxu1 %v732_v43  ;;  %v1015_v42 = vsel %vm1013_vm0, %v1008_v38, 0 }
  0xf2   : > { %956 = vmatprep.subr.bf16.mxu0 %v1507_v25 }
  0xf4   : > { %1300 = vmatpush3.bf16.msra.mxu1 %v724_v51 }
  0xf5   : > { %957 = vmatpush1.bf16.msra.mxu0 %v739_v52  ;;  %1301 = vmatprep.subr.bf16.mxu1 %v733_v53 }
  0xf6   : > { %958 = vmatprep.subr.bf16.mxu0 %v1507_v25 }
  0xf8   : > { %1302 = vmatpush3.bf16.msra.mxu1 %v725_v60 }
  0xf9   : > { %959 = vmatpush1.bf16.msra.mxu0 %v740_v61  ;;  %1303 = vmatprep.subr.bf16.mxu1 %v734_v62 }
  0xfa   : > { %960 = vmatprep.subr.bf16.mxu0 %v1507_v25 }
  0xfc   : > { %1304 = vmatpush3.bf16.msra.mxu1 %v726_v6 }
  0xfd   : > { %961 = vmatpush1.bf16.msra.mxu0 %v741_v7  ;;  %1305 = vmatprep.subr.bf16.mxu1 %v735_v8 }
  0xfe   : > { %962 = vmatprep.subr.bf16.mxu0 %v1507_v25 }
 0x100   : > { %1306 = vmatpush3.bf16.msra.mxu1 %v727_v14 }
 0x101   : > { %963 = vmatpush1.bf16.msra.mxu0 %v742_v15  ;;  %1332 = vmatprep.subr.bf16.mxu1 %v1504_v2 }
 0x102   : > { %964 = vmatprep.subr.bf16.mxu0 %v1507_v25 }
 0x103   : > { %1188 = vmatmul.mubr.msk.bf16.vlgmr.msra.gmra.mrb[12].mxu1 %vm1187_vm15, %v1509_v50 }
 0x104   : > { %1333 = vmatpush3.bf16.msra.mxu1 %v1005_v20  ;;  %1340 = vmatprep.mubr.msk.bf16.mxu1 %vm1506_vm2, %v1504_v2  ;;  %vm1001_vm2 = vcmp.eq.s32.totalorder %v1000_v33, %v1640_v39 }
 0x105   : > { %965 = vmatpush1.bf16.msra.mxu0 %v743_v21  ;;  %1334 = vmatprep.subr.bf16.mxu1 %v1504_v2  ;;  %v1192_v41 = vsel %vm1001_vm2, 1.0, %v1504_v2 }
 0x106   : > { %966 = vmatprep.subr.bf16.mxu0 %v1507_v25  ;;  %v1004_v43 = vpack.c.bf16 %v1192_v41, %v1192_v41 }
 0x108   : > { %1335 = vmatpush3.bf16.msra.mxu1 %v1006_v27 }
 0x109   : > { %967 = vmatpush1.bf16.msra.mxu0 %v744_v28  ;;  %1336 = vmatprep.subr.bf16.mxu1 %v1504_v2 }
 0x10a   : > { %968 = vmatprep.subr.bf16.mxu0 %v1507_v25 }
 0x10c   : > { %1337 = vmatpush3.bf16.msra.mxu1 %v1007_v35 }
 0x10d   : > { %969 = vmatpush1.bf16.msra.mxu0 %v745_v37  ;;  %1338 = vmatprep.subr.bf16.mxu1 %v1504_v2 }
 0x110   : > { %1191 = vmatmul.mubr.msk.bf16.vlgmr.msra.gmra.mrb[12].mxu0 %vm1190_vm3, %v1509_v50  ;;  %1339 = vmatpush3.bf16.msra.mxu1 %v1015_v42 }
 0x113   : > { %1341 = vmatmul.mubr.msk.bf16.vlgmr.msra.gmra.mrb[16].mxu1 %vm1009_vm4, %v1004_v43 }
 0x176   : > { %v392_v39 = vpop.f32.mrb[0].mxu1 }
 0x177   : > { %v1330_v44 = vpop.f32.mrb[1].mxu1 }
 0x178   : > { %v395_v25 = vpop.f32.mrb[2].mxu1 }
 0x179   : > { %v1331_v45 = vpop.f32.mrb[3].mxu1 }
 0x17b   : > { %v332_v40 = vpop.f32.mrb[0].mxu0 }
 0x17c   : > { %v338_v47 = vadd.f32 %v332_v40, %v274_v46  ;;  %v1324_v48 = vpop.f32.mrb[1].mxu0 }
 0x17d   : > { %v335_v2 = vpop.f32.mrb[2].mxu0 }
 0x17e   : > { %v398_v49 = vadd.f32 %v392_v39, %v338_v47  ;;  %v1325_v51 = vpop.f32.mrb[3].mxu0 }
 0x196   : > { %v1219_v52 = vpop.f32.mrb[4].mxu1 }
 0x197   : > { %v1220_v53 = vpop.f32.mrb[5].mxu1 }
 0x198   : > { %v1221_v50 = vadd.f32 %v1220_v53, %v1219_v52  ;;  %v1222_v54 = vpop.f32.mrb[6].mxu1 }
 0x199   : > { %v1223_v55 = vpop.f32.mrb[7].mxu1 }
 0x19b   : > { %v1241_v56 = vpop.f32.mrb[4].mxu0 }
 0x19c   : > { %v1242_v57 = vpop.f32.mrb[5].mxu0 }
 0x19d   : > { %v1243_v58 = vadd.f32 %v1242_v57, %v1241_v56  ;;  %v1244_v59 = vpop.f32.mrb[6].mxu0 }
 0x19e   : > { %v1245_v60 = vpop.f32.mrb[7].mxu0 }
 0x19f   : > { %v825_v61 = vadd.f32 %v1243_v58, %v1221_v50 }
 0x1b6   : > { %v1263_v62 = vpop.f32.mrb[8].mxu1 }
 0x1b7   : > { %v1264_v63 = vpop.f32.mrb[9].mxu1 }
 0x1b8   : > { %v1265_v0 = vadd.f32 %v1264_v63, %v1263_v62  ;;  %v1266_v1 = vpop.f32.mrb[10].mxu1 }
 0x1b9   : > { %v1267_v3 = vpop.f32.mrb[11].mxu1 }
 0x1ba   : > { %v865_v4 = vadd.f32 %v1265_v0, %v825_v61 }
 0x1bb   : > { %v1285_v5 = vpop.f32.mrb[8].mxu0 }
 0x1bc   : > { %v1286_v6 = vpop.f32.mrb[9].mxu0 }
 0x1bd   : > { %v1287_v7 = vadd.f32 %v1286_v6, %v1285_v5  ;;  %v1288_v8 = vpop.f32.mrb[10].mxu0 }
 0x1be   : > { %v1289_v9 = vpop.f32.mrb[11].mxu0 }
 0x1bf   : > { %v905_v10 = vadd.f32 %v1287_v7, %v865_v4 }
 0x1d6   : > { %v1307_v11 = vpop.f32.mrb[12].mxu1 }
 0x1d7   : > { %v1308_v12 = vpop.f32.mrb[13].mxu1 }
 0x1d8   : > { %v1309_v13 = vadd.f32 %v1308_v12, %v1307_v11  ;;  %v1310_v14 = vpop.f32.mrb[14].mxu1 }
 0x1d9   : > { %v1311_v15 = vpop.f32.mrb[15].mxu1 }
 0x1da   : > { %v945_v16 = vadd.f32 %v1309_v13, %v905_v10 }
 0x1dc   : > { %v1346_v17 = vadd.f32 %v945_v16, %v398_v49 }
 0x1e3   : > { %v984_v18 = vpop.f32.mrb[12].mxu0 }
 0x1e4   : > { %v1347_v19 = vadd.f32 %v1346_v17, %v984_v18  ;;  %v986_v20 = vpop.f32.mrb[13].mxu0 }
 0x1e5   : > { %v987_v21 = vpop.f32.mrb[14].mxu0 }
 0x1e6   : > { %v988_v22 = vpop.f32.mrb[15].mxu0  ;;  %v1051_v23 = vpop.f32.mrb[16].mxu1 }
 0x1e7   : > { %v1348_v24 = vadd.f32 %v1347_v19, %v1051_v23  ;;  %v1342_v26 = vpop.f32.mrb[17].mxu1 }
 0x1e8   : > { %v1054_v27 = vpop.f32.mrb[18].mxu1 }
 0x1e9   : > { %v1343_v28 = vpop.f32.mrb[19].mxu1  ;;  %1058 = vst.msk [vmem:[%s264_s11] sm:$0xff] %vm746_vm12, %v1348_v24 }
 0x1ea   : > { %1435 = shalt.err (!%p1432_p5)
}
 0x1eb   : > { %s1436_s20 = scalar_lea.hbm %s2272_s15, 128  ;;  %s1440_s30 = scalar_lea.hbm %s2326_s6, 256 }
 0x1ec   : > { %p1437_p6 = scmp.ne.s32.totalorder %s2272_s15, %s1436_s20  ;;  %p1441_p10 = scmp.lt.u32.totalorder %s2272_s15, %s2326_s6 }
 0x1ed   : > { %p1442_p11 = scmp.lt.u32.totalorder %s1440_s30, %s1436_s20  ;;  %p1444_p13 = scmp.lt.u32.totalorder %s1436_s20, %s2272_s15 }
 0x1ee   : > { %p1438_p7 = pnand %p1437_p6, %p1586_p4 }
 0x1ef   : > { %p1443_p12 = por %p1442_p11, %p1441_p10 }
 0x1f0   : > { %p1439_p9 = pneg %p1438_p7 }
 0x1f1   : > { %p1445_p0 = por %p1444_p13, %p1443_p12 }
 0x1f3   : > { %p1446_p1 = pnand %p1445_p0, %p1439_p9 }
 0x1f5   : > { %1449 = shalt.err (!%p1446_p1)
}
 0x1f6   : > { %1354 = dma.vmem_to_hbm [thread:$0]  (%p1586_p4), %s2274_s12, 128, %s2272_s15, %s1060_s24  }
 0x1f7 PF: > { %p1360_p2 = scmp.ge.s32.totalorder %s1500_s26, 2  ;;  %s1086_s13 = sand.u32 1, %s1480_s21  }
 0x1f8   : > { %s1087_s14 = scalar_lea.sflag [#allocation3], %s1086_s13 }
 0x1f9   : > { %p1357_p3 = pnand %p1360_p2, %p1593_p8 }
 0x1fb   : > { %1475 = dma.done.wait (!%p1357_p3), %s1087_s14, 128  }
 0x1fc   : > { %1477 = vsyncadd (!%p1357_p3), %s1087_s14, 4294967168  ;;  %s19_s26 = sadd.s32 1, %s1500_s26   ;;  %s2333_s21 = smov %s1484_s22 }
 0x1fd   : > { %p16_p5 = scmp.ge.s32.totalorder %s19_s26, 4   ;;  %s2334_s22 = smov %s1488_s23 }
 0x1fe   : > { %s2335_s23 = smov %s1599_s10  ;;  %s2336_s24 = smov %s1496_s25 }
 0x1ff   : > { %s2337_s25 = smov %s2339_s29  ;;  %18 = sbr.rel (!%p16_p5) target bundleno = 4 (0x4), region = 79 }
 0x206   :  { %1092 = vsyncpa [#allocation3], 1 }
 0x207   :  { %1094 = vsyncpa [#allocation3 + $0x1], 1 }

</bundles_post_ra>
